<compile_context>
chip_gen: v7x
topology: tpu7x:2x2x1
jax: 0.10.0
libtpu: 0.0.40
codegen_flags: <defaults>
</compile_context>

<pallas_src>
import jax
import jax.numpy as jnp
from jax.experimental import pallas as pl
from jax.experimental.pallas import tpu as pltpu


def _conv_out_len(L):
    # Conv1d(kernel_size=3, stride=2, padding=1)
    return (L + 2 - 3) // 2 + 1


def make_trend_vae_encoder(seq_len, feat_dim, hidden_layer_sizes, latent_dim):
    """Returns (pack_params, forward) implementing TrendVAEEncoder.forward."""
    # Static per-layer dims: (L_in, C_in, L_out, C_out), channel-last layout.
    dims = []
    L, c_in = seq_len, feat_dim
    for c_out in hidden_layer_sizes:
        L_out = _conv_out_len(L)
        dims.append((L, c_in, L_out, c_out))
        L, c_in = L_out, c_out
    l_fin, c_fin = L, c_in                      # final activation (l_fin, c_fin)
    n_layers = len(dims)

    # -------- parameter preprocessing: done once, off the hot path ----------
    def pack_params(params):
        conv_w, conv_b = [], []
        for w, b in params["convs"]:            # w: (Cout, Cin, 3) torch layout
            conv_w.append(jnp.transpose(w, (2, 1, 0)).astype(jnp.float32))   # (3, Cin, Cout)
            conv_b.append(b.reshape(1, -1).astype(jnp.float32))              # (1, Cout)

        def _head_weight(w):                    # w: (latent, Cf*Lf), torch Flatten order d = c*Lf + l
            # Kernel activation is channel-last (Lf, Cf); permute the weight rows
            # so the head consumes it directly (no runtime transpose of h).
            return jnp.transpose(w.T.reshape(c_fin, l_fin, latent_dim),
                                 (1, 0, 2)).astype(jnp.float32)              # (Lf, Cf, latent)

        wm, bm = params["z_mean"]
        wv, bv = params["z_log_var"]
        return {
            "conv_w": tuple(conv_w),
            "conv_b": tuple(conv_b),
            "wm": _head_weight(wm), "bm": bm.reshape(1, latent_dim).astype(jnp.float32),
            "wv": _head_weight(wv), "bv": bv.reshape(1, latent_dim).astype(jnp.float32),
        }

    # -------- fused kernel: one batch element per grid step ------------------
    def kernel(*refs):
        x_ref = refs[0]
        conv_w = refs[1:1 + n_layers]
        conv_b = refs[1 + n_layers:1 + 2 * n_layers]
        wm_ref, bm_ref, wv_ref, bv_ref = refs[1 + 2 * n_layers:5 + 2 * n_layers]
        zm_ref, zv_ref = refs[5 + 2 * n_layers:7 + 2 * n_layers]
        scratch = refs[7 + 2 * n_layers:]       # n_layers padded bufs + final buf

        # Stage the zero-padded input activation in VMEM scratch.
        l0, c0 = dims[0][0], dims[0][1]
        s0 = scratch[0]
        zrow = jnp.zeros((1, c0), jnp.float32)
        s0[pl.ds(0, 1), :] = zrow
        s0[pl.ds(l0 + 1, 1), :] = zrow
        s0[pl.ds(1, l0), :] = x_ref[0].astype(jnp.float32)

        # Conv1d(k=3, s=2, p=1) + ReLU stack; activations never leave VMEM.
        for i, (l_in, c_in_i, l_out, c_out_i) in enumerate(dims):
            h_in = scratch[i]
            w_ref, b_ref = conv_w[i], conv_b[i]
            acc = jnp.zeros((l_out, c_out_i), jnp.float32)
            for k in range(3):
                # rows 2*t + k of the padded input, t = 0..l_out-1 (stride-2 read)
                tap = h_in[pl.ds(k, l_out, stride=2), :]           # (l_out, c_in)
                acc = acc + jnp.dot(tap, w_ref[k],
                                    preferred_element_type=jnp.float32)
            y = jnp.maximum(acc + b_ref[...], 0.0)

            h_out = scratch[i + 1]
            if i + 1 < n_layers:
                zr = jnp.zeros((1, c_out_i), jnp.float32)
                h_out[pl.ds(0, 1), :] = zr
                h_out[pl.ds(l_out + 1, 1), :] = zr
                h_out[pl.ds(1, l_out), :] = y
            else:
                h_out[...] = y                                      # (l_fin, c_fin)

        # Dense heads; the PyTorch Flatten permutation is baked into wm/wv.
        h_fin = scratch[n_layers]
        acc_m = bm_ref[...]                                         # (1, latent)
        acc_v = bv_ref[...]
        for l in range(l_fin):
            row = h_fin[pl.ds(l, 1), :]                             # (1, c_fin)
            acc_m = acc_m + jnp.dot(row, wm_ref[l],
                                    preferred_element_type=jnp.float32)
            acc_v = acc_v + jnp.dot(row, wv_ref[l],
                                    preferred_element_type=jnp.float32)
        zm_ref[0] = acc_m.astype(zm_ref.dtype)
        zv_ref[0] = acc_v.astype(zv_ref.dtype)

    # -------- wrapper ---------------------------------------------------------
    def forward(x, packed):
        batch = x.shape[0]
        inputs = ([x] + list(packed["conv_w"]) + list(packed["conv_b"])
                  + [packed["wm"], packed["bm"], packed["wv"], packed["bv"]])

        def _resident_spec(a):                  # whole array in VMEM, fetched once
            return pl.BlockSpec(a.shape, lambda b, _nd=a.ndim: (0,) * _nd)

        in_specs = [pl.BlockSpec((1, seq_len, feat_dim), lambda b: (b, 0, 0))]
        in_specs += [_resident_spec(a) for a in inputs[1:]]

        out_shape = (jax.ShapeDtypeStruct((batch, 1, latent_dim), x.dtype),
                     jax.ShapeDtypeStruct((batch, 1, latent_dim), x.dtype))
        out_specs = (pl.BlockSpec((1, 1, latent_dim), lambda b: (b, 0, 0)),
                     pl.BlockSpec((1, 1, latent_dim), lambda b: (b, 0, 0)))

        scratch_shapes = [pltpu.VMEM((l_in + 2, c_in_i), jnp.float32)
                          for (l_in, c_in_i, _, _) in dims]
        scratch_shapes.append(pltpu.VMEM((l_fin, c_fin), jnp.float32))

        flops = sum(2 * 3 * lo * ci * co for (_, ci, lo, co) in dims)
        flops += 2 * l_fin * c_fin * (2 * latent_dim)
        flops *= batch
        bytes_accessed = sum(a.size * a.dtype.itemsize for a in inputs)
        bytes_accessed += 2 * batch * latent_dim * x.dtype.itemsize

        zm, zv = pl.pallas_call(
            kernel,
            grid=(batch,),
            in_specs=in_specs,
            out_specs=out_specs,
            out_shape=out_shape,
            scratch_shapes=scratch_shapes,
            compiler_params=pltpu.CompilerParams(
                dimension_semantics=("parallel",)),
            cost_estimate=pl.CostEstimate(
                flops=int(flops), transcendentals=0,
                bytes_accessed=int(bytes_accessed)),
        )(*inputs)
        return zm.reshape(batch, latent_dim), zv.reshape(batch, latent_dim)

    return pack_params, forward


# ------------------------- pure-JAX reference (verification) -----------------
def reference_forward(x, params):
    h = jnp.transpose(x, (0, 2, 1))             # (B, C, L) -- matches x.permute(0,2,1)
    for w, b in params["convs"]:
        h = jax.lax.conv_general_dilated(
            h, w, window_strides=(2,), padding=((1, 1),),
            dimension_numbers=("NCH", "OIH", "NCH"))
        h = jax.nn.relu(h + b[None, :, None])
    flat = h.reshape(h.shape[0], -1)
    wm, bm = params["z_mean"]
    wv, bv = params["z_log_var"]
    return flat @ wm.T + bm, flat @ wv.T + bv


# ------------------------- deterministic init (PyTorch shapes) ----------------
def init_params(key, seq_len, feat_dim, hidden_layer_sizes, latent_dim):
    params = {"convs": []}
    c_in, L = feat_dim, seq_len
    for c_out in hidden_layer_sizes:
        key, k1, k2 = jax.random.split(key, 3)
        params["convs"].append((
            jax.random.normal(k1, (c_out, c_in, 3), jnp.float32) * 0.1,   # Conv1d weight
            jax.random.normal(k2, (c_out,), jnp.float32) * 0.1,           # Conv1d bias
        ))
        c_in = c_out
        L = _conv_out_len(L)
    d = hidden_layer_sizes[-1] * L               # == _get_last_dense_dim
    key, k1, k2, k3, k4 = jax.random.split(key, 5)
    params["z_mean"] = (jax.random.normal(k1, (latent_dim, d), jnp.float32) * 0.1,
                        jax.random.normal(k2, (latent_dim,), jnp.float32) * 0.1)
    params["z_log_var"] = (jax.random.normal(k3, (latent_dim, d), jnp.float32) * 0.1,
                           jax.random.normal(k4, (latent_dim,), jnp.float32) * 0.1)
    return params


if __name__ == "__main__":
    batch, seq_len, feat_dim = 2, 16, 4
    hidden_layer_sizes = (8, 16)
    latent_dim = 8

    key = jax.random.PRNGKey(0)
    key, kx, kp = jax.random.split(key, 3)
    x = jax.random.normal(kx, (batch, seq_len, feat_dim), jnp.float32)
    params = init_params(kp, seq_len, feat_dim, hidden_layer_sizes, latent_dim)

    pack_params, forward = make_trend_vae_encoder(
        seq_len, feat_dim, hidden_layer_sizes, latent_dim)
    packed = pack_params(params)                 # one-time weight repacking

    fwd = jax.jit(forward)
    z_mean, z_log_var = fwd(x, packed)
    jax.block_until_ready((z_mean, z_log_var))

    ref_mean, ref_log_var = reference_forward(x, params)
    assert z_mean.shape == (batch, latent_dim)
    assert z_log_var.shape == (batch, latent_dim)
    assert jnp.allclose(z_mean, ref_mean, atol=1e-4, rtol=1e-4)
    assert jnp.allclose(z_log_var, ref_log_var, atol=1e-4, rtol=1e-4)

    print("KERNEL_OK")
</pallas_src>

<mosaic_0001>
module attributes {stable_mosaic.version = 11 : i64} {
  func.func @kernel(%arg0: i32, %arg1: memref<1x16x4xf32, #tpu.memory_space<vmem>>, %arg2: memref<3x4x8xf32, #tpu.memory_space<vmem>>, %arg3: memref<3x8x16xf32, #tpu.memory_space<vmem>>, %arg4: memref<1x8xf32, #tpu.memory_space<vmem>>, %arg5: memref<1x16xf32, #tpu.memory_space<vmem>>, %arg6: memref<4x16x8xf32, #tpu.memory_space<vmem>>, %arg7: memref<1x8xf32, #tpu.memory_space<vmem>>, %arg8: memref<4x16x8xf32, #tpu.memory_space<vmem>>, %arg9: memref<1x8xf32, #tpu.memory_space<vmem>>, %arg10: memref<1x1x8xf32, #tpu.memory_space<vmem>>, %arg11: memref<1x1x8xf32, #tpu.memory_space<vmem>>, %arg12: memref<18x4xf32, #tpu.memory_space<vmem>>, %arg13: memref<10x8xf32, #tpu.memory_space<vmem>>, %arg14: memref<4x16xf32, #tpu.memory_space<vmem>>) attributes {dimension_semantics = [#tpu.dimension_semantics<parallel>], iteration_bounds = array<i64: 2>, scalar_prefetch = 0 : i64, scratch_operands = 3 : i64, tpu.core_type = #tpu.core_type<tc>, window_params = [{transform_indices = @transform_0, window_bounds = array<i64: 1, 16, 4>}, {pipeline_mode = #tpu.pipeline_mode<synchronous>, transform_indices = @transform_1, window_bounds = array<i64: 3, 4, 8>}, {pipeline_mode = #tpu.pipeline_mode<synchronous>, transform_indices = @transform_2, window_bounds = array<i64: 3, 8, 16>}, {pipeline_mode = #tpu.pipeline_mode<synchronous>, transform_indices = @transform_3, window_bounds = array<i64: 1, 8>}, {pipeline_mode = #tpu.pipeline_mode<synchronous>, transform_indices = @transform_4, window_bounds = array<i64: 1, 16>}, {pipeline_mode = #tpu.pipeline_mode<synchronous>, transform_indices = @transform_5, window_bounds = array<i64: 4, 16, 8>}, {pipeline_mode = #tpu.pipeline_mode<synchronous>, transform_indices = @transform_6, window_bounds = array<i64: 1, 8>}, {pipeline_mode = #tpu.pipeline_mode<synchronous>, transform_indices = @transform_7, window_bounds = array<i64: 4, 16, 8>}, {pipeline_mode = #tpu.pipeline_mode<synchronous>, transform_indices = @transform_8, window_bounds = array<i64: 1, 8>}, {transform_indices = @transform_9, window_bounds = array<i64: 1, 1, 8>}, {transform_indices = @transform_10, window_bounds = array<i64: 1, 1, 8>}]} {
    %cst = arith.constant 0.000000e+00 : f32
    %0 = vector.broadcast %cst : f32 to vector<1x4xf32>
    %c0 = arith.constant 0 : index
    %c0_0 = arith.constant 0 : index
    %1 = vector.load %arg12[%c0, %c0_0] : memref<18x4xf32, #tpu.memory_space<vmem>>, vector<1x4xf32>
    tpu.vector_store %arg12[%c0, %c0_0], %0 {strides = array<i32>} : memref<18x4xf32, #tpu.memory_space<vmem>>, vector<1x4xf32>,
    %c17 = arith.constant 17 : index
    %c0_1 = arith.constant 0 : index
    %2 = vector.load %arg12[%c17, %c0_1] : memref<18x4xf32, #tpu.memory_space<vmem>>, vector<1x4xf32>
    tpu.vector_store %arg12[%c17, %c0_1], %0 {strides = array<i32>} : memref<18x4xf32, #tpu.memory_space<vmem>>, vector<1x4xf32>,
    %c0_2 = arith.constant 0 : index
    %c0_3 = arith.constant 0 : index
    %c0_4 = arith.constant 0 : index
    %3 = vector.load %arg1[%c0_2, %c0_3, %c0_4] : memref<1x16x4xf32, #tpu.memory_space<vmem>>, vector<1x16x4xf32>
    %4 = vector.shape_cast %3 : vector<1x16x4xf32> to vector<16x4xf32>
    %c1 = arith.constant 1 : index
    %c0_5 = arith.constant 0 : index
    %5 = vector.load %arg12[%c1, %c0_5] : memref<18x4xf32, #tpu.memory_space<vmem>>, vector<16x4xf32>
    tpu.vector_store %arg12[%c1, %c0_5], %4 {strides = array<i32>} : memref<18x4xf32, #tpu.memory_space<vmem>>, vector<16x4xf32>,
    %cst_6 = arith.constant 0.000000e+00 : f32
    %6 = vector.broadcast %cst_6 : f32 to vector<8x8xf32>
    %c0_7 = arith.constant 0 : index
    %c0_8 = arith.constant 0 : index
    %7 = tpu.strided_load %arg12[%c0_7, %c0_8] {strides = array<i32: 2, 1>} : memref<18x4xf32, #tpu.memory_space<vmem>>, vector<8x4xf32>
    %c0_9 = arith.constant 0 : index
    %c0_10 = arith.constant 0 : index
    %c0_11 = arith.constant 0 : index
    %8 = vector.load %arg2[%c0_9, %c0_10, %c0_11] : memref<3x4x8xf32, #tpu.memory_space<vmem>>, vector<1x4x8xf32>
    %9 = vector.shape_cast %8 : vector<1x4x8xf32> to vector<4x8xf32>
    %cst_12 = arith.constant dense<0.000000e+00> : vector<8x8xf32>
    %10 = tpu.matmul %7, %9, %cst_12 {dimension_numbers = #tpu.dot_dimension_numbers<[1], [0], [0], [1], [0, 0, 1, 1], [], []>} : vector<8x4xf32>, vector<4x8xf32>, vector<8x8xf32> -> vector<8x8xf32>
    %11 = arith.addf %6, %10 : vector<8x8xf32>
    %c1_13 = arith.constant 1 : index
    %c0_14 = arith.constant 0 : index
    %12 = tpu.strided_load %arg12[%c1_13, %c0_14] {strides = array<i32: 2, 1>} : memref<18x4xf32, #tpu.memory_space<vmem>>, vector<8x4xf32>
    %c1_15 = arith.constant 1 : index
    %c0_16 = arith.constant 0 : index
    %c0_17 = arith.constant 0 : index
    %13 = vector.load %arg2[%c1_15, %c0_16, %c0_17] : memref<3x4x8xf32, #tpu.memory_space<vmem>>, vector<1x4x8xf32>
    %14 = vector.shape_cast %13 : vector<1x4x8xf32> to vector<4x8xf32>
    %cst_18 = arith.constant dense<0.000000e+00> : vector<8x8xf32>
    %15 = tpu.matmul %12, %14, %cst_18 {dimension_numbers = #tpu.dot_dimension_numbers<[1], [0], [0], [1], [0, 0, 1, 1], [], []>} : vector<8x4xf32>, vector<4x8xf32>, vector<8x8xf32> -> vector<8x8xf32>
    %16 = arith.addf %11, %15 : vector<8x8xf32>
    %c2 = arith.constant 2 : index
    %c0_19 = arith.constant 0 : index
    %17 = tpu.strided_load %arg12[%c2, %c0_19] {strides = array<i32: 2, 1>} : memref<18x4xf32, #tpu.memory_space<vmem>>, vector<8x4xf32>
    %c2_20 = arith.constant 2 : index
    %c0_21 = arith.constant 0 : index
    %c0_22 = arith.constant 0 : index
    %18 = vector.load %arg2[%c2_20, %c0_21, %c0_22] : memref<3x4x8xf32, #tpu.memory_space<vmem>>, vector<1x4x8xf32>
    %19 = vector.shape_cast %18 : vector<1x4x8xf32> to vector<4x8xf32>
    %cst_23 = arith.constant dense<0.000000e+00> : vector<8x8xf32>
    %20 = tpu.matmul %17, %19, %cst_23 {dimension_numbers = #tpu.dot_dimension_numbers<[1], [0], [0], [1], [0, 0, 1, 1], [], []>} : vector<8x4xf32>, vector<4x8xf32>, vector<8x8xf32> -> vector<8x8xf32>
    %21 = arith.addf %16, %20 : vector<8x8xf32>
    %c0_24 = arith.constant 0 : index
    %c0_25 = arith.constant 0 : index
    %22 = vector.load %arg4[%c0_24, %c0_25] : memref<1x8xf32, #tpu.memory_space<vmem>>, vector<1x8xf32>
    %23 = vector.broadcast %22 : vector<1x8xf32> to vector<8x8xf32>
    %24 = arith.addf %21, %23 : vector<8x8xf32>
    %cst_26 = arith.constant 0.000000e+00 : f32
    %25 = vector.broadcast %cst_26 : f32 to vector<8x8xf32>
    %26 = arith.maximumf %24, %25 : vector<8x8xf32>
    %cst_27 = arith.constant 0.000000e+00 : f32
    %27 = vector.broadcast %cst_27 : f32 to vector<1x8xf32>
    %c0_28 = arith.constant 0 : index
    %c0_29 = arith.constant 0 : index
    %28 = vector.load %arg13[%c0_28, %c0_29] : memref<10x8xf32, #tpu.memory_space<vmem>>, vector<1x8xf32>
    tpu.vector_store %arg13[%c0_28, %c0_29], %27 {strides = array<i32>} : memref<10x8xf32, #tpu.memory_space<vmem>>, vector<1x8xf32>,
    %c9 = arith.constant 9 : index
    %c0_30 = arith.constant 0 : index
    %29 = vector.load %arg13[%c9, %c0_30] : memref<10x8xf32, #tpu.memory_space<vmem>>, vector<1x8xf32>
    tpu.vector_store %arg13[%c9, %c0_30], %27 {strides = array<i32>} : memref<10x8xf32, #tpu.memory_space<vmem>>, vector<1x8xf32>,
    %c1_31 = arith.constant 1 : index
    %c0_32 = arith.constant 0 : index
    %30 = vector.load %arg13[%c1_31, %c0_32] : memref<10x8xf32, #tpu.memory_space<vmem>>, vector<8x8xf32>
    tpu.vector_store %arg13[%c1_31, %c0_32], %26 {strides = array<i32>} : memref<10x8xf32, #tpu.memory_space<vmem>>, vector<8x8xf32>,
    %cst_33 = arith.constant 0.000000e+00 : f32
    %31 = vector.broadcast %cst_33 : f32 to vector<4x16xf32>
    %c0_34 = arith.constant 0 : index
    %c0_35 = arith.constant 0 : index
    %32 = tpu.strided_load %arg13[%c0_34, %c0_35] {strides = array<i32: 2, 1>} : memref<10x8xf32, #tpu.memory_space<vmem>>, vector<4x8xf32>
    %c0_36 = arith.constant 0 : index
    %c0_37 = arith.constant 0 : index
    %c0_38 = arith.constant 0 : index
    %33 = vector.load %arg3[%c0_36, %c0_37, %c0_38] : memref<3x8x16xf32, #tpu.memory_space<vmem>>, vector<1x8x16xf32>
    %34 = vector.shape_cast %33 : vector<1x8x16xf32> to vector<8x16xf32>
    %cst_39 = arith.constant dense<0.000000e+00> : vector<4x16xf32>
    %35 = tpu.matmul %32, %34, %cst_39 {dimension_numbers = #tpu.dot_dimension_numbers<[1], [0], [0], [1], [0, 0, 1, 1], [], []>} : vector<4x8xf32>, vector<8x16xf32>, vector<4x16xf32> -> vector<4x16xf32>
    %36 = arith.addf %31, %35 : vector<4x16xf32>
    %c1_40 = arith.constant 1 : index
    %c0_41 = arith.constant 0 : index
    %37 = tpu.strided_load %arg13[%c1_40, %c0_41] {strides = array<i32: 2, 1>} : memref<10x8xf32, #tpu.memory_space<vmem>>, vector<4x8xf32>
    %c1_42 = arith.constant 1 : index
    %c0_43 = arith.constant 0 : index
    %c0_44 = arith.constant 0 : index
    %38 = vector.load %arg3[%c1_42, %c0_43, %c0_44] : memref<3x8x16xf32, #tpu.memory_space<vmem>>, vector<1x8x16xf32>
    %39 = vector.shape_cast %38 : vector<1x8x16xf32> to vector<8x16xf32>
    %cst_45 = arith.constant dense<0.000000e+00> : vector<4x16xf32>
    %40 = tpu.matmul %37, %39, %cst_45 {dimension_numbers = #tpu.dot_dimension_numbers<[1], [0], [0], [1], [0, 0, 1, 1], [], []>} : vector<4x8xf32>, vector<8x16xf32>, vector<4x16xf32> -> vector<4x16xf32>
    %41 = arith.addf %36, %40 : vector<4x16xf32>
    %c2_46 = arith.constant 2 : index
    %c0_47 = arith.constant 0 : index
    %42 = tpu.strided_load %arg13[%c2_46, %c0_47] {strides = array<i32: 2, 1>} : memref<10x8xf32, #tpu.memory_space<vmem>>, vector<4x8xf32>
    %c2_48 = arith.constant 2 : index
    %c0_49 = arith.constant 0 : index
    %c0_50 = arith.constant 0 : index
    %43 = vector.load %arg3[%c2_48, %c0_49, %c0_50] : memref<3x8x16xf32, #tpu.memory_space<vmem>>, vector<1x8x16xf32>
    %44 = vector.shape_cast %43 : vector<1x8x16xf32> to vector<8x16xf32>
    %cst_51 = arith.constant dense<0.000000e+00> : vector<4x16xf32>
    %45 = tpu.matmul %42, %44, %cst_51 {dimension_numbers = #tpu.dot_dimension_numbers<[1], [0], [0], [1], [0, 0, 1, 1], [], []>} : vector<4x8xf32>, vector<8x16xf32>, vector<4x16xf32> -> vector<4x16xf32>
    %46 = arith.addf %41, %45 : vector<4x16xf32>
    %c0_52 = arith.constant 0 : index
    %c0_53 = arith.constant 0 : index
    %47 = vector.load %arg5[%c0_52, %c0_53] : memref<1x16xf32, #tpu.memory_space<vmem>>, vector<1x16xf32>
    %48 = vector.broadcast %47 : vector<1x16xf32> to vector<4x16xf32>
    %49 = arith.addf %46, %48 : vector<4x16xf32>
    %cst_54 = arith.constant 0.000000e+00 : f32
    %50 = vector.broadcast %cst_54 : f32 to vector<4x16xf32>
    %51 = arith.maximumf %49, %50 : vector<4x16xf32>
    %c0_55 = arith.constant 0 : index
    %c0_56 = arith.constant 0 : index
    %52 = vector.load %arg14[%c0_55, %c0_56] : memref<4x16xf32, #tpu.memory_space<vmem>>, vector<4x16xf32>
    tpu.vector_store %arg14[%c0_55, %c0_56], %51 {strides = array<i32>} : memref<4x16xf32, #tpu.memory_space<vmem>>, vector<4x16xf32>,
    %c0_57 = arith.constant 0 : index
    %c0_58 = arith.constant 0 : index
    %53 = vector.load %arg7[%c0_57, %c0_58] : memref<1x8xf32, #tpu.memory_space<vmem>>, vector<1x8xf32>
    %c0_59 = arith.constant 0 : index
    %c0_60 = arith.constant 0 : index
    %54 = vector.load %arg9[%c0_59, %c0_60] : memref<1x8xf32, #tpu.memory_space<vmem>>, vector<1x8xf32>
    %c0_61 = arith.constant 0 : index
    %c0_62 = arith.constant 0 : index
    %55 = vector.load %arg14[%c0_61, %c0_62] : memref<4x16xf32, #tpu.memory_space<vmem>>, vector<1x16xf32>
    %c0_63 = arith.constant 0 : index
    %c0_64 = arith.constant 0 : index
    %c0_65 = arith.constant 0 : index
    %56 = vector.load %arg6[%c0_63, %c0_64, %c0_65] : memref<4x16x8xf32, #tpu.memory_space<vmem>>, vector<1x16x8xf32>
    %57 = vector.shape_cast %56 : vector<1x16x8xf32> to vector<16x8xf32>
    %cst_66 = arith.constant dense<0.000000e+00> : vector<1x8xf32>
    %58 = tpu.matmul %55, %57, %cst_66 {dimension_numbers = #tpu.dot_dimension_numbers<[1], [0], [0], [1], [0, 0, 1, 1], [], []>} : vector<1x16xf32>, vector<16x8xf32>, vector<1x8xf32> -> vector<1x8xf32>
    %59 = arith.addf %53, %58 : vector<1x8xf32>
    %c0_67 = arith.constant 0 : index
    %c0_68 = arith.constant 0 : index
    %c0_69 = arith.constant 0 : index
    %60 = vector.load %arg8[%c0_67, %c0_68, %c0_69] : memref<4x16x8xf32, #tpu.memory_space<vmem>>, vector<1x16x8xf32>
    %61 = vector.shape_cast %60 : vector<1x16x8xf32> to vector<16x8xf32>
    %cst_70 = arith.constant dense<0.000000e+00> : vector<1x8xf32>
    %62 = tpu.matmul %55, %61, %cst_70 {dimension_numbers = #tpu.dot_dimension_numbers<[1], [0], [0], [1], [0, 0, 1, 1], [], []>} : vector<1x16xf32>, vector<16x8xf32>, vector<1x8xf32> -> vector<1x8xf32>
    %63 = arith.addf %54, %62 : vector<1x8xf32>
    %c1_71 = arith.constant 1 : index
    %c0_72 = arith.constant 0 : index
    %64 = vector.load %arg14[%c1_71, %c0_72] : memref<4x16xf32, #tpu.memory_space<vmem>>, vector<1x16xf32>
    %c1_73 = arith.constant 1 : index
    %c0_74 = arith.constant 0 : index
    %c0_75 = arith.constant 0 : index
    %65 = vector.load %arg6[%c1_73, %c0_74, %c0_75] : memref<4x16x8xf32, #tpu.memory_space<vmem>>, vector<1x16x8xf32>
    %66 = vector.shape_cast %65 : vector<1x16x8xf32> to vector<16x8xf32>
    %cst_76 = arith.constant dense<0.000000e+00> : vector<1x8xf32>
    %67 = tpu.matmul %64, %66, %cst_76 {dimension_numbers = #tpu.dot_dimension_numbers<[1], [0], [0], [1], [0, 0, 1, 1], [], []>} : vector<1x16xf32>, vector<16x8xf32>, vector<1x8xf32> -> vector<1x8xf32>
    %68 = arith.addf %59, %67 : vector<1x8xf32>
    %c1_77 = arith.constant 1 : index
    %c0_78 = arith.constant 0 : index
    %c0_79 = arith.constant 0 : index
    %69 = vector.load %arg8[%c1_77, %c0_78, %c0_79] : memref<4x16x8xf32, #tpu.memory_space<vmem>>, vector<1x16x8xf32>
    %70 = vector.shape_cast %69 : vector<1x16x8xf32> to vector<16x8xf32>
    %cst_80 = arith.constant dense<0.000000e+00> : vector<1x8xf32>
    %71 = tpu.matmul %64, %70, %cst_80 {dimension_numbers = #tpu.dot_dimension_numbers<[1], [0], [0], [1], [0, 0, 1, 1], [], []>} : vector<1x16xf32>, vector<16x8xf32>, vector<1x8xf32> -> vector<1x8xf32>
    %72 = arith.addf %63, %71 : vector<1x8xf32>
    %c2_81 = arith.constant 2 : index
    %c0_82 = arith.constant 0 : index
    %73 = vector.load %arg14[%c2_81, %c0_82] : memref<4x16xf32, #tpu.memory_space<vmem>>, vector<1x16xf32>
    %c2_83 = arith.constant 2 : index
    %c0_84 = arith.constant 0 : index
    %c0_85 = arith.constant 0 : index
    %74 = vector.load %arg6[%c2_83, %c0_84, %c0_85] : memref<4x16x8xf32, #tpu.memory_space<vmem>>, vector<1x16x8xf32>
    %75 = vector.shape_cast %74 : vector<1x16x8xf32> to vector<16x8xf32>
    %cst_86 = arith.constant dense<0.000000e+00> : vector<1x8xf32>
    %76 = tpu.matmul %73, %75, %cst_86 {dimension_numbers = #tpu.dot_dimension_numbers<[1], [0], [0], [1], [0, 0, 1, 1], [], []>} : vector<1x16xf32>, vector<16x8xf32>, vector<1x8xf32> -> vector<1x8xf32>
    %77 = arith.addf %68, %76 : vector<1x8xf32>
    %c2_87 = arith.constant 2 : index
    %c0_88 = arith.constant 0 : index
    %c0_89 = arith.constant 0 : index
    %78 = vector.load %arg8[%c2_87, %c0_88, %c0_89] : memref<4x16x8xf32, #tpu.memory_space<vmem>>, vector<1x16x8xf32>
    %79 = vector.shape_cast %78 : vector<1x16x8xf32> to vector<16x8xf32>
    %cst_90 = arith.constant dense<0.000000e+00> : vector<1x8xf32>
    %80 = tpu.matmul %73, %79, %cst_90 {dimension_numbers = #tpu.dot_dimension_numbers<[1], [0], [0], [1], [0, 0, 1, 1], [], []>} : vector<1x16xf32>, vector<16x8xf32>, vector<1x8xf32> -> vector<1x8xf32>
    %81 = arith.addf %72, %80 : vector<1x8xf32>
    %c3 = arith.constant 3 : index
    %c0_91 = arith.constant 0 : index
    %82 = vector.load %arg14[%c3, %c0_91] : memref<4x16xf32, #tpu.memory_space<vmem>>, vector<1x16xf32>
    %c3_92 = arith.constant 3 : index
    %c0_93 = arith.constant 0 : index
    %c0_94 = arith.constant 0 : index
    %83 = vector.load %arg6[%c3_92, %c0_93, %c0_94] : memref<4x16x8xf32, #tpu.memory_space<vmem>>, vector<1x16x8xf32>
    %84 = vector.shape_cast %83 : vector<1x16x8xf32> to vector<16x8xf32>
    %cst_95 = arith.constant dense<0.000000e+00> : vector<1x8xf32>
    %85 = tpu.matmul %82, %84, %cst_95 {dimension_numbers = #tpu.dot_dimension_numbers<[1], [0], [0], [1], [0, 0, 1, 1], [], []>} : vector<1x16xf32>, vector<16x8xf32>, vector<1x8xf32> -> vector<1x8xf32>
    %86 = arith.addf %77, %85 : vector<1x8xf32>
    %c3_96 = arith.constant 3 : index
    %c0_97 = arith.constant 0 : index
    %c0_98 = arith.constant 0 : index
    %87 = vector.load %arg8[%c3_96, %c0_97, %c0_98] : memref<4x16x8xf32, #tpu.memory_space<vmem>>, vector<1x16x8xf32>
    %88 = vector.shape_cast %87 : vector<1x16x8xf32> to vector<16x8xf32>
    %cst_99 = arith.constant dense<0.000000e+00> : vector<1x8xf32>
    %89 = tpu.matmul %82, %88, %cst_99 {dimension_numbers = #tpu.dot_dimension_numbers<[1], [0], [0], [1], [0, 0, 1, 1], [], []>} : vector<1x16xf32>, vector<16x8xf32>, vector<1x8xf32> -> vector<1x8xf32>
    %90 = arith.addf %81, %89 : vector<1x8xf32>
    %c0_100 = arith.constant 0 : index
    %c0_101 = arith.constant 0 : index
    %c0_102 = arith.constant 0 : index
    %91 = vector.load %arg10[%c0_100, %c0_101, %c0_102] : memref<1x1x8xf32, #tpu.memory_space<vmem>>, vector<1x1x8xf32>
    %92 = vector.shape_cast %91 : vector<1x1x8xf32> to vector<1x8xf32>
    %93 = vector.shape_cast %86 : vector<1x8xf32> to vector<1x1x8xf32>
    tpu.vector_store %arg10[%c0_100, %c0_101, %c0_102], %93 {strides = array<i32>} : memref<1x1x8xf32, #tpu.memory_space<vmem>>, vector<1x1x8xf32>,
    %c0_103 = arith.constant 0 : index
    %c0_104 = arith.constant 0 : index
    %c0_105 = arith.constant 0 : index
    %94 = vector.load %arg11[%c0_103, %c0_104, %c0_105] : memref<1x1x8xf32, #tpu.memory_space<vmem>>, vector<1x1x8xf32>
    %95 = vector.shape_cast %94 : vector<1x1x8xf32> to vector<1x8xf32>
    %96 = vector.shape_cast %90 : vector<1x8xf32> to vector<1x1x8xf32>
    tpu.vector_store %arg11[%c0_103, %c0_104, %c0_105], %96 {strides = array<i32>} : memref<1x1x8xf32, #tpu.memory_space<vmem>>, vector<1x1x8xf32>,
    return
  }
  func.func @transform_0(%arg0: i32) -> (i32, i32, i32) {
    %c0_i32 = arith.constant 0 : i32
    %c0_i32_0 = arith.constant 0 : i32
    %c0_i32_1 = arith.constant 0 : i32
    return %arg0, %c0_i32, %c0_i32_0 : i32, i32, i32
  }
  func.func @transform_1(%arg0: i32) -> (i32, i32, i32) {
    %c0_i32 = arith.constant 0 : i32
    %c0_i32_0 = arith.constant 0 : i32
    %c0_i32_1 = arith.constant 0 : i32
    %c0_i32_2 = arith.constant 0 : i32
    return %c0_i32, %c0_i32_0, %c0_i32_1 : i32, i32, i32
  }
  func.func @transform_2(%arg0: i32) -> (i32, i32, i32) {
    %c0_i32 = arith.constant 0 : i32
    %c0_i32_0 = arith.constant 0 : i32
    %c0_i32_1 = arith.constant 0 : i32
    %c0_i32_2 = arith.constant 0 : i32
    return %c0_i32, %c0_i32_0, %c0_i32_1 : i32, i32, i32
  }
  func.func @transform_3(%arg0: i32) -> (i32, i32) {
    %c0_i32 = arith.constant 0 : i32
    %c0_i32_0 = arith.constant 0 : i32
    %c0_i32_1 = arith.constant 0 : i32
    return %c0_i32, %c0_i32_0 : i32, i32
  }
  func.func @transform_4(%arg0: i32) -> (i32, i32) {
    %c0_i32 = arith.constant 0 : i32
    %c0_i32_0 = arith.constant 0 : i32
    %c0_i32_1 = arith.constant 0 : i32
    return %c0_i32, %c0_i32_0 : i32, i32
  }
  func.func @transform_5(%arg0: i32) -> (i32, i32, i32) {
    %c0_i32 = arith.constant 0 : i32
    %c0_i32_0 = arith.constant 0 : i32
    %c0_i32_1 = arith.constant 0 : i32
    %c0_i32_2 = arith.constant 0 : i32
    return %c0_i32, %c0_i32_0, %c0_i32_1 : i32, i32, i32
  }
  func.func @transform_6(%arg0: i32) -> (i32, i32) {
    %c0_i32 = arith.constant 0 : i32
    %c0_i32_0 = arith.constant 0 : i32
    %c0_i32_1 = arith.constant 0 : i32
    return %c0_i32, %c0_i32_0 : i32, i32
  }
  func.func @transform_7(%arg0: i32) -> (i32, i32, i32) {
    %c0_i32 = arith.constant 0 : i32
    %c0_i32_0 = arith.constant 0 : i32
    %c0_i32_1 = arith.constant 0 : i32
    %c0_i32_2 = arith.constant 0 : i32
    return %c0_i32, %c0_i32_0, %c0_i32_1 : i32, i32, i32
  }
  func.func @transform_8(%arg0: i32) -> (i32, i32) {
    %c0_i32 = arith.constant 0 : i32
    %c0_i32_0 = arith.constant 0 : i32
    %c0_i32_1 = arith.constant 0 : i32
    return %c0_i32, %c0_i32_0 : i32, i32
  }
  func.func @transform_9(%arg0: i32) -> (i32, i32, i32) {
    %c0_i32 = arith.constant 0 : i32
    %c0_i32_0 = arith.constant 0 : i32
    %c0_i32_1 = arith.constant 0 : i32
    return %arg0, %c0_i32, %c0_i32_0 : i32, i32, i32
  }
  func.func @transform_10(%arg0: i32) -> (i32, i32, i32) {
    %c0_i32 = arith.constant 0 : i32
    %c0_i32_0 = arith.constant 0 : i32
    %c0_i32_1 = arith.constant 0 : i32
    return %arg0, %c0_i32, %c0_i32_0 : i32, i32, i32
  }
}

</mosaic_0001>

<bundles_post_ra>
// kernel: forward.1
= control target key start
LH: loop header
LB: loop body
LE: loop exit
PB: predicated region body
PF: predicated region fallthrough
CT: control target
= control target key end

     0   :  { %s2270_s0 = inlined_call_operand.vmem [shape: f32[2,16,4], index: 0, kind: input, shape index: {}]   ;;  %s2271_s1 = inlined_call_operand.vmem [shape: f32[3,4,8], index: 1, kind: input, shape index: {}]   ;;  %s2272_s2 = inlined_call_operand.vmem [shape: f32[3,8,16], index: 2, kind: input, shape index: {}]   ;;  %s2273_s3 = inlined_call_operand.vmem [shape: f32[1,8], index: 3, kind: input, shape index: {}]   ;;  %s2274_s4 = inlined_call_operand.vmem [shape: f32[1,16], index: 4, kind: input, shape index: {}]   ;;  %s2275_s5 = inlined_call_operand.vmem [shape: f32[4,16,8], index: 5, kind: input, shape index: {}]   ;;  %s2276_s6 = inlined_call_operand.vmem [shape: f32[1,8], index: 6, kind: input, shape index: {}]   ;;  %s2277_s7 = inlined_call_operand.vmem [shape: f32[4,16,8], index: 7, kind: input, shape index: {}]   ;;  %s2278_s8 = inlined_call_operand.vmem [shape: f32[1,8], index: 8, kind: input, shape index: {}]   ;;  %s2279_s9 = inlined_call_operand.hbm [shape: f32[2,1,8], index: 9, kind: output, shape index: {0}]   ;;  %s2280_s10 = inlined_call_operand.hbm [shape: f32[2,1,8], index: 10, kind: output, shape index: {1}]  }
   0x1   :  { %2281 = sst [smem:[#allocation11_spill]] %s2270_s0 }
   0x2   :  { %2282 = sst [smem:[#allocation12_spill]] %s2271_s1 }
   0x3   :  { %16 = vsyncpa [#allocation6], 0 }
   0x4   :  { %18 = vsyncpa [#allocation6 + $0x1], 0 }
   0x5   :  { %19 = vsyncpa [#allocation8], 0 }
   0x6   :  { %21 = vsyncpa [#allocation8 + $0x1], 0  ;;  %s2003_s13 = smov 0   ;;  %s2005_s14 = smov 0  }
   0x7   :  { %s2007_s15 = smov 0   ;;  %s2009_s16 = smov 0  }
   0x8 LB: > { %s2024_s17 = sadd.s32 4294967295, %s1941_s16   ;;  %s1594_s18 = sadd.s32 4294967294, %s1941_s16   ;;  %s1941_s16 = sphi %s2009_s16, %s2290_s16   ;;  %s1937_s15 = sphi %s2007_s15, %s2289_s15   ;;  %s1933_s14 = sphi %s2005_s14, %s2288_s14   ;;  %s1929_s13 = sphi %s2003_s13, %s2287_s13  }
   0x9   : > { %s2028_s19 = sadd.s32 1, %s1941_s16   ;;  %s228_s20 = sadd.s32 1, %s1937_s15 }
   0xa   : > { %s225_s21 = ssub.s32 %s1941_s16, %s2028_s19  ;;  %p238_p0 = scmp.ne.s32.totalorder %s1937_s15, %s1933_s14 }
   0xb   : > { %p226_p1 = scmp.eq.s32.totalorder %s225_s21, 0  ;;  %p239_p2 = scmp.eq.s32.totalorder %s2024_s17, 1 }
   0xc   : > { %p244_p3 = scmp.ne.s32.totalorder %s1933_s14, %s1929_s13  ;;  %p245_p4 = scmp.eq.s32.totalorder %s1594_s18, 1 }
   0xd   : > { %s2039_s22 = scalar_select %p226_p1, %s1937_s15, %s228_s20  }
   0xe   : > { %p2041_p5 = por %p239_p2, %p238_p0  ;;  %p2045_p6 = por %p245_p4, %p244_p3 }
   0xf   : > { %p1597_p7 = scmp.ge.s32.totalorder %s1941_s16, 1  ;;  %p321_p8 = scmp.lt.s32.totalorder %s1941_s16, 3 }
  0x11   : > { %p322_p9 = pnand %p1597_p7, %p321_p8 }
  0x12   : > { %s2285_s1 = sld [smem:[#allocation12_spill]] (!%p322_p9)  ;;  %vm384_vm0 = vcmask (!%p322_p9), 1043456   ;;  %p362_p10 = scmp.lt.s32.totalorder (!%p322_p9), %s2024_s17, 1  ;;  %v1943_v1 = vmov (!%p322_p9), 0.0   ;;  %vm367_vm1 = vcmask (!%p322_p9), 24576   ;;  %vm1944_vm2 = vmmov (!%p322_p9), 0  }
  0x13   : > { %325 = sbr.rel (%p322_p9) target bundleno = 774 (0x306), region = 56  ;;  %1676 = vmatprep.subr.mxu0 (!%p322_p9), %v1943_v1  ;;  %1681 = vmatprep.subr.mxu1 (!%p322_p9), %v1943_v1  ;;  %368 = vst.msk [vmem:[#allocation2] sm:$0x1] (!%p322_p9), %vm367_vm1, %v1943_v1  ;;  %vm372_vm3 = vcmask (!%p322_p9), 31744   ;;  %s2286_s0 = sld [smem:[#allocation11_spill]] (!%p322_p9)  ;;  %vm624_vm4 = vcmask (!%p322_p9), 57344  }
  0x14   : > { %1678 = vmatprep.mubr.msk.f32.mxu0 (!%p322_p9), %vm1944_vm2, %v1943_v1  ;;  %1683 = vmatprep.mubr.msk.f32.mxu1 (!%p322_p9), %vm1944_vm2, %v1943_v1  ;;  %v1609_v9 = vld [vmem:[%s2272_s2 + $0x8] sm:$0xff] (!%p322_p9)  ;;  %v630_v10 = vld [vmem:[%s2272_s2] sm:$0xff] (!%p322_p9)  ;;  %625 = vst.msk [vmem:[#allocation3] sm:$0x1] (!%p322_p9), %vm624_vm4, %v1943_v1  ;;  %vm627_vm5 = vcmask (!%p322_p9), 64512   ;;  %v1612_v22 = vld [vmem:[%s2272_s2 + $0x10] sm:$0xff] (!%p322_p9) }
  0x15   : > { %v1608_v17 = vld [vmem:[%s2273_s3] ss:$0 sm:$0xff] (!%p322_p9)  ;;  %v874_v27 = vld [vmem:[%s2275_s5 + $0x8] sm:$0xff] (!%p322_p9)  ;;  %v1945_v29 = vmov (!%p322_p9), 0.0|0.0   ;;  %vm868_vm6 = vcmask (!%p322_p9), 125952   ;;  %v1617_v44 = vld [vmem:[%s2275_s5 + $0x10] sm:$0xff] (!%p322_p9) }
  0x16   : > { %v873_v26 = vld [vmem:[%s2275_s5] sm:$0xff] (!%p322_p9)  ;;  %v951_v31 = vld [vmem:[%s2277_s7 + $0x8] sm:$0xff] (!%p322_p9)  ;;  %v1618_v45 = vld [vmem:[%s2275_s5 + $0x18] sm:$0xff] (!%p322_p9)  ;;  %vm875_vm7 = vcmask (!%p322_p9), 130048   ;;  %s2182_s20 = sand.u32 (!%p322_p9), 1, %s1933_s14   ;;  %s1635_s21 = sshll.u32 (!%p322_p9), %s2024_s17, 4 }
  0x17   : > { %v950_v28 = vld [vmem:[%s2277_s7] sm:$0xff] (!%p322_p9)  ;;  %v1763_v30 = vpack.c.bf16 (!%p322_p9), %v874_v27, %v873_v26  ;;  %v1620_v46 = vld [vmem:[%s2277_s7 + $0x10] sm:$0xff] (!%p322_p9)  ;;  %v1621_v47 = vld [vmem:[%s2277_s7 + $0x18] sm:$0xff] (!%p322_p9)  ;;  %v1769_v48 = vpack.c.bf16 (!%p322_p9), %v1618_v45, %v1617_v44  ;;  %s361_s11 = scalar_lea.vmem (!%p322_p9), [#allocation7], %s2182_s20  ;;  %s2203_s27 = scalar_lea.hbm (!%p322_p9), %s2280_s10, %s1635_s21 }
  0x18   : > { %v1600_v0 = vld [vmem:[%s2285_s1 + $0x4] sm:$0xf] (!%p322_p9)  ;;  %v376_v2 = vld [vmem:[%s2285_s1] sm:$0xf] (!%p322_p9)  ;;  %v1605_v5 = vld [vmem:[%s2285_s1 + $0x8] sm:$0xf] (!%p322_p9)  ;;  %v1766_v32 = vpack.c.bf16 (!%p322_p9), %v951_v31, %v950_v28  ;;  %v1772_v49 = vpack.c.bf16 (!%p322_p9), %v1621_v47, %v1620_v46 }
  0x19   : > { %1677 = vmatpush3.msk.msra.mxu0 (!%p322_p9), %vm384_vm0, %v1600_v0  ;;  %1682 = vmatpush3.msk.msra.mxu1 (!%p322_p9), %vm384_vm0, %v376_v2  ;;  %v1614_v39 = vld [vmem:[%s2274_s4] ss:$0 sm:$0xff] (!%p322_p9)  ;;  %v1624_v52 = vld [vmem:[%s2275_s5 + $0x28] sm:$0xff] (!%p322_p9)  ;;  %v1629_v58 = vld [vmem:[%s2275_s5 + $0x30] sm:$0xff] (!%p322_p9)  ;;  %s1511_s12 = sshll.u32 (!%p322_p9), %s361_s11, 4  ;;  %s2205_s12 = int_to_ptr.vmem [resolvable:$true] %s1511_s12 }
  0x1a   : > { %s363_s29 = scalar_select %p362_p10, %s2024_s17, 1  ;;  %1686 = vmatprep.subr.mxu0 %v1943_v1  ;;  %1691 = vmatprep.subr.mxu1 %v1943_v1  ;;  %v1623_v51 = vld [vmem:[%s2275_s5 + $0x20] sm:$0xff]  ;;  %v1627_v54 = vld [vmem:[%s2277_s7 + $0x28] sm:$0xff]  ;;  %v1630_v59 = vld [vmem:[%s2275_s5 + $0x38] sm:$0xff] }
  0x1b   : > { %v1626_v53 = vld [vmem:[%s2277_s7 + $0x20] sm:$0xff]  ;;  %v1775_v55 = vpack.c.bf16 %v1624_v52, %v1623_v51  ;;  %v1632_v60 = vld [vmem:[%s2277_s7 + $0x30] sm:$0xff]  ;;  %v1633_v61 = vld [vmem:[%s2277_s7 + $0x38] sm:$0xff]  ;;  %v1781_v62 = vpack.c.bf16 %v1630_v59, %v1629_v58  ;;  %s2196_s17 = scalar_lea.hbm %s2279_s9, %s1635_s21 }
  0x1c   : > { %s1639_s30 = sshll.u32 %s363_s29, 4  ;;  %v1778_v56 = vpack.c.bf16 %v1627_v54, %v1626_v53  ;;  %v1784_v63 = vpack.c.bf16 %v1633_v61, %v1632_v60  ;;  %s355_s29 = scalar_lea.vmem [#allocation5], %s2182_s20 }
  0x1d   : > { %s366_s18 = scalar_lea.vmem %s2286_s0, %s1639_s30  ;;  %s1498_s30 = sshll.u32 %s355_s29, 4  ;;  %s2198_s30 = int_to_ptr.vmem [resolvable:$true] %s1498_s30 }
  0x1e   : > { %v370_v3 = vld [vmem:[%s366_s18] sm:$0xff]  ;;  %v371_v4 = vld [vmem:[%s366_s18 + $0x8] sm:$0xff]  ;;  %s1482_s0 = scalar_lea.sflag [#allocation6], %s2182_s20  ;;  %s1847_s28 = scalar_lea.vmem %s2198_s30, 16 }
  0x1f   : > { %373 = vst.msk [vmem:[#allocation2 + $0x1] sm:$0xff] %vm372_vm3, %v370_v3  ;;  %374 = vst.msk [vmem:[#allocation2 + $0x9] sm:$0xff] %vm372_vm3, %v371_v4  ;;  %v870_v3 = vld [vmem:[%s2276_s6] sm:$0x1]  ;;  %p1848_p11 = scmp.ne.s32.totalorder %s2198_s30, %s1847_s28  ;;  %s1946_s18 = smov [#allocation5]  }
  0x20   : > { %v871_v4 = vld [vmem:[%s2278_s8] sm:$0x1]  ;;  %s1851_s1 = sshll.u32 %s1946_s18, 4  ;;  %s1852_s1 = int_to_ptr.vmem [resolvable:$false] %s1851_s1 }
  0x21   : > { %p1849_p12 = pnand %p1848_p11, %p2041_p5  ;;  %s1853_s25 = scalar_lea.vmem %s1852_s1, 32 }
  0x22   : > { %p1854_p0 = scmp.lt.s32.totalorder %s2198_s30, %s1852_s1  ;;  %p1855_p1 = scmp.lt.s32.totalorder %s1853_s25, %s1847_s28 }
  0x23   : > { %p1850_p13 = pneg %p1849_p12 }
  0x24   : > { %p1856_p2 = por %p1855_p1, %p1854_p0 }
  0x26   : > { %v378_v6 = vld [vmem:[#allocation2 + $0x1] ss:$2 sm:$0xff]  ;;  %v375_v7 = vld [vmem:[#allocation2] ss:$2 sm:$0xff]  ;;  %p1857_p3 = pnand %p1856_p2, %p1850_p13 }
  0x27   : > { %1679 = vmatmul.mubr.msk.f32.vlgmr.msra.gmra.mrb[0].mxu0 %vm372_vm3, %v378_v6  ;;  %1684 = vmatmul.mubr.msk.f32.vlgmr.msra.gmra.mrb[0].mxu1 %vm372_vm3, %v375_v7  ;;  %v535_v8 = vld [vmem:[#allocation2 + $0x2] ss:$2 sm:$0xff] }
  0x28   : > { %1687 = vmatpush3.msk.msra.mxu0 %vm384_vm0, %v1605_v5  ;;  %1688 = vmatprep.mubr.msk.f32.mxu0 %vm1944_vm2, %v1943_v1 }
  0x29   : > { %1696 = vmatprep.subr.mxu0 %v1943_v1  ;;  %1693 = vmatprep.mubr.msk.f32.mxu1 %vm1944_vm2, %v1943_v1 }
  0x2a   : > { %1692 = vmatpush3.msra.mxu1 %v1609_v9 }
  0x2b   : > { %1689 = vmatmul.mubr.msk.f32.vlgmr.msra.gmra.mrb[2].mxu0 %vm372_vm3, %v535_v8  ;;  %1701 = vmatprep.subr.mxu1 %v1943_v1 }
  0x2c   : > { %1698 = vmatprep.mubr.msk.f32.mxu0 %vm1944_vm2, %v1943_v1  ;;  %1697 = vmatpush3.msra.mxu0 %v630_v10 }
  0x2d   : > { %1762 = vmatprep.subr.bf16.mxu0 %v1945_v29 }
  0xfa   : > { %v454_v11 = vpop.f32.mrb[0].mxu0  ;;  %v530_v12 = vpop.f32.mrb[0].mxu1 }
  0xfb   : > { %v531_v13 = vadd.f32 %v530_v12, %v454_v11  ;;  %v1680_v14 = vpop.f32.mrb[1].mxu0  ;;  %v1685_v15 = vpop.f32.mrb[1].mxu1 }
  0xfe   : > { %v610_v16 = vpop.f32.mrb[2].mxu0 }
  0xff   : > { %v614_v18 = vadd.f32 %v610_v16, %v531_v13  ;;  %v1690_v19 = vpop.f32.mrb[3].mxu0 }
 0x101   : > { %v622_v20 = vadd.f32 %v1608_v17, %v614_v18 }
 0x103   : > { %v623_v21 = vmax.f32 %v622_v20, 0.0 }
 0x105   : > { %628 = vst.msk [vmem:[#allocation3 + $0x1] sm:$0xff] %vm627_vm5, %v623_v21 }
 0x10c   : > { %v632_v23 = vld [vmem:[#allocation3 + $0x1] ss:$2 sm:$0xf]  ;;  %v629_v24 = vld [vmem:[#allocation3] ss:$2 sm:$0xf] }
 0x10d   : > { %1694 = vmatmul.mubr.msk.f32.vlgmr.msra.gmra.mrb[2].mxu1 %vm627_vm5, %v632_v23  ;;  %1699 = vmatmul.mubr.msk.f32.vlgmr.msra.gmra.mrb[4].mxu0 %vm627_vm5, %v629_v24  ;;  %v782_v25 = vld [vmem:[#allocation3 + $0x2] ss:$2 sm:$0xf] }
 0x10e   : > { %1702 = vmatpush3.msra.mxu1 %v1612_v22  ;;  %1703 = vmatprep.mubr.msk.f32.mxu1 %vm1944_vm2, %v1943_v1 }
 0x10f   : > { %1710 = vmatprep.mubr.msk.f32.mxu0 %vm1944_vm2, %v1943_v1  ;;  %1765 = vmatprep.subr.bf16.mxu1 %v1945_v29 }
 0x110   : > { %1764 = vmatpush3.bf16.msra.mxu0 %v1763_v30 }
 0x111   : > { %1704 = vmatmul.mubr.msk.f32.vlgmr.msra.gmra.mrb[4].mxu1 %vm627_vm5, %v782_v25  ;;  %1768 = vmatprep.subr.bf16.mxu0 %v1945_v29 }
 0x112   : > { %1717 = vmatprep.mubr.msk.f32.mxu1 %vm1944_vm2, %v1943_v1  ;;  %1767 = vmatpush3.bf16.msra.mxu1 %v1766_v32 }
 0x113   : > { %1771 = vmatprep.subr.bf16.mxu1 %v1945_v29 }
 0x1e0   : > { %v704_v33 = vpop.f32.mrb[2].mxu1  ;;  %v777_v34 = vpop.f32.mrb[4].mxu0 }
 0x1e1   : > { %v778_v35 = vadd.f32 %v777_v34, %v704_v33  ;;  %v1695_v36 = vpop.f32.mrb[3].mxu1  ;;  %v1700_v37 = vpop.f32.mrb[5].mxu0 }
 0x1e4   : > { %v854_v38 = vpop.f32.mrb[4].mxu1 }
 0x1e5   : > { %v858_v40 = vadd.f32 %v854_v38, %v778_v35  ;;  %v1705_v41 = vpop.f32.mrb[5].mxu1 }
 0x1e7   : > { %v866_v42 = vadd.f32 %v1614_v39, %v858_v40 }
 0x1e9   : > { %v867_v43 = vmax.f32 %v866_v42, 0.0 }
 0x1eb   : > { %869 = vst.msk [vmem:[#allocation4] sm:$0xf] %vm868_vm6, %v867_v43 }
 0x1f2   : > { %v872_v50 = vld [vmem:[#allocation4] sm:$0x1]  ;;  %v1023_v57 = vld [vmem:[#allocation4 + $0x1] sm:$0x1]  ;;  %v1175_v0 = vld [vmem:[#allocation4 + $0x2] sm:$0x1] }
 0x1f3   : > { %1711 = vmatmul.mubr.msk.f32.vlgmr.msra.gmra.mrb[6].mxu0 %vm875_vm7, %v872_v50  ;;  %1718 = vmatmul.mubr.msk.f32.vlgmr.msra.gmra.mrb[6].mxu1 %vm875_vm7, %v872_v50  ;;  %v1327_v2 = vld [vmem:[#allocation4 + $0x3] sm:$0x1] }
 0x1f4   : > { %1770 = vmatpush3.bf16.msra.mxu0 %v1769_v48  ;;  %1773 = vmatpush3.bf16.msra.mxu1 %v1772_v49 }
 0x1f5   : > { %1724 = vmatprep.mubr.msk.f32.mxu0 %vm1944_vm2, %v1943_v1  ;;  %1731 = vmatprep.mubr.msk.f32.mxu1 %vm1944_vm2, %v1943_v1 }
 0x1f6   : > { %1774 = vmatprep.subr.bf16.mxu0 %v1945_v29  ;;  %1777 = vmatprep.subr.bf16.mxu1 %v1945_v29 }
 0x1fb   : > { %1725 = vmatmul.mubr.msk.f32.vlgmr.msra.gmra.mrb[6].mxu0 %vm875_vm7, %v1023_v57  ;;  %1732 = vmatmul.mubr.msk.f32.vlgmr.msra.gmra.mrb[6].mxu1 %vm875_vm7, %v1023_v57 }
 0x1fc   : > { %1776 = vmatpush3.bf16.msra.mxu0 %v1775_v55  ;;  %1779 = vmatpush3.bf16.msra.mxu1 %v1778_v56 }
 0x1fd   : > { %1738 = vmatprep.mubr.msk.f32.mxu0 %vm1944_vm2, %v1943_v1  ;;  %1745 = vmatprep.mubr.msk.f32.mxu1 %vm1944_vm2, %v1943_v1 }
 0x1fe   : > { %1780 = vmatprep.subr.bf16.mxu0 %v1945_v29  ;;  %1783 = vmatprep.subr.bf16.mxu1 %v1945_v29 }
 0x203   : > { %1739 = vmatmul.mubr.msk.f32.vlgmr.msra.gmra.mrb[6].mxu0 %vm875_vm7, %v1175_v0  ;;  %1746 = vmatmul.mubr.msk.f32.vlgmr.msra.gmra.mrb[6].mxu1 %vm875_vm7, %v1175_v0 }
 0x204   : > { %1782 = vmatpush3.bf16.msra.mxu0 %v1781_v62  ;;  %1785 = vmatpush3.bf16.msra.mxu1 %v1784_v63 }
 0x205   : > { %1752 = vmatprep.mubr.msk.f32.mxu0 %vm1944_vm2, %v1943_v1  ;;  %1759 = vmatprep.mubr.msk.f32.mxu1 %vm1944_vm2, %v1943_v1 }
 0x20b   : > { %1753 = vmatmul.mubr.msk.f32.vlgmr.msra.gmra.mrb[6].mxu0 %vm875_vm7, %v1327_v2  ;;  %1760 = vmatmul.mubr.msk.f32.vlgmr.msra.gmra.mrb[6].mxu1 %vm875_vm7, %v1327_v2 }
 0x2de   : > { %v1400_v1 = vpop.f32.mrb[6].mxu0  ;;  %v1474_v5 = vpop.f32.mrb[6].mxu1 }
 0x2df   : > { %v1786_v6 = vadd.f32 %v1400_v1, %v870_v3  ;;  %v1787_v7 = vadd.f32 %v1474_v5, %v871_v4  ;;  %v1754_v8 = vpop.f32.mrb[7].mxu0  ;;  %v1761_v9 = vpop.f32.mrb[7].mxu1 }
 0x2e1   : > { %1479 = vst.msk [vmem:[%s355_s29] sm:$0x1] %vm624_vm4, %v1786_v6  ;;  %1480 = vst.msk [vmem:[%s361_s11] sm:$0x1] %vm624_vm4, %v1787_v7 }
 0x2e2   : > { %1860 = shalt.err (!%p1857_p3)
}
 0x2e3   : > { %s1861_s21 = scalar_lea.hbm %s2196_s17, 16  ;;  %s1865_s26 = scalar_lea.hbm %s2279_s9, 32 }
 0x2e4   : > { %p1862_p4 = scmp.ne.s32.totalorder %s2196_s17, %s1861_s21  ;;  %p1866_p9 = scmp.lt.u32.totalorder %s2196_s17, %s2279_s9 }
 0x2e5   : > { %p1867_p10 = scmp.lt.u32.totalorder %s1865_s26, %s1861_s21  ;;  %p1869_p12 = scmp.lt.u32.totalorder %s1861_s21, %s2196_s17 }
 0x2e6   : > { %p1863_p7 = pnand %p1862_p4, %p2041_p5 }
 0x2e7   : > { %p1868_p11 = por %p1867_p10, %p1866_p9 }
 0x2e8   : > { %p1864_p8 = pneg %p1863_p7 }
 0x2e9   : > { %p1870_p13 = por %p1869_p12, %p1868_p11 }
 0x2eb   : > { %p1871_p0 = pnand %p1870_p13, %p1864_p8 }
 0x2ed   : > { %1874 = shalt.err (!%p1871_p0)
}
 0x2ee   : > { %1800 = dma.vmem_to_hbm [thread:$0]  (%p2041_p5), %s2198_s30, 16, %s2196_s17, %s1482_s0  }
 0x2ef   : > { %s1486_s28 = scalar_lea.sflag [#allocation8], %s2182_s20  ;;  %s1875_s25 = scalar_lea.vmem %s2205_s12, 16 }
 0x2f0   : > { %p1876_p1 = scmp.ne.s32.totalorder %s2205_s12, %s1875_s25  ;;  %s1947_s21 = smov [#allocation7]  }
 0x2f1   : > { %s1879_s29 = sshll.u32 %s1947_s21, 4  ;;  %s1880_s29 = int_to_ptr.vmem [resolvable:$false] %s1879_s29 }
 0x2f2   : > { %p1877_p2 = pnand %p1876_p1, %p2041_p5  ;;  %s1881_s11 = scalar_lea.vmem %s1880_s29, 32 }
 0x2f3   : > { %p1882_p4 = scmp.lt.s32.totalorder %s2205_s12, %s1880_s29  ;;  %p1883_p7 = scmp.lt.s32.totalorder %s1881_s11, %s1875_s25 }
 0x2f4   : > { %p1878_p3 = pneg %p1877_p2 }
 0x2f5   : > { %p1884_p8 = por %p1883_p7, %p1882_p4 }
 0x2f7   : > { %p1885_p9 = pnand %p1884_p8, %p1878_p3 }
 0x2f9   : > { %1888 = shalt.err (!%p1885_p9)
}
 0x2fa   : > { %s1889_s20 = scalar_lea.hbm %s2203_s27, 16  ;;  %s1893_s0 = scalar_lea.hbm %s2280_s10, 32 }
 0x2fb   : > { %p1890_p10 = scmp.ne.s32.totalorder %s2203_s27, %s1889_s20  ;;  %p1894_p13 = scmp.lt.u32.totalorder %s2203_s27, %s2280_s10 }
 0x2fc   : > { %p1895_p0 = scmp.lt.u32.totalorder %s1893_s0, %s1889_s20  ;;  %p1897_p2 = scmp.lt.u32.totalorder %s1889_s20, %s2203_s27 }
 0x2fd   : > { %p1891_p11 = pnand %p1890_p10, %p2041_p5 }
 0x2fe   : > { %p1896_p1 = por %p1895_p0, %p1894_p13 }
 0x2ff   : > { %p1892_p12 = pneg %p1891_p11 }
 0x300   : > { %p1898_p3 = por %p1897_p2, %p1896_p1 }
 0x302   : > { %p1899_p4 = pnand %p1898_p3, %p1892_p12 }
 0x304   : > { %1902 = shalt.err (!%p1899_p4)
}
 0x305   : > { %1801 = dma.vmem_to_hbm [thread:$0]  (%p2041_p5), %s2205_s12, 16, %s2203_s27, %s1486_s28  }
 0x306 PF: > { %p1811_p7 = scmp.ge.s32.totalorder %s1941_s16, 2  ;;  %s1523_s1 = sand.u32 1, %s1929_s13  }
 0x307   : > { %s1524_s25 = scalar_lea.sflag [#allocation6], %s1523_s1 }
 0x308   : > { %p1805_p8 = pnand %p1811_p7, %p2045_p6 }
 0x30a   : > { %1920 = dma.done.wait (!%p1805_p8), %s1524_s25, 16  }
 0x30b   : > { %1922 = vsyncadd (!%p1805_p8), %s1524_s25, 4294967280  ;;  %s1532_s21 = scalar_lea.sflag [#allocation8], %s1523_s1 }
 0x30c   : > { %1924 = dma.done.wait (!%p1805_p8), %s1532_s21, 16  }
 0x30d   : > { %1926 = vsyncadd (!%p1805_p8), %s1532_s21, 4294967280  ;;  %p24_p5 = scmp.ge.s32.totalorder %s2028_s19, 4   ;;  %s2287_s13 = smov %s1933_s14 }
 0x30e   : > { %s2288_s14 = smov %s1937_s15  ;;  %s2289_s15 = smov %s2039_s22 }
 0x30f   : > { %s2290_s16 = smov %s2028_s19  ;;  %26 = sbr.rel (!%p24_p5) target bundleno = 8 (0x8), region = 122 }
 0x316   :  { %1536 = vsyncpa [#allocation6], 1 }
 0x317   :  { %1538 = vsyncpa [#allocation6 + $0x1], 1 }
 0x318   :  { %1539 = vsyncpa [#allocation8], 1 }
 0x319   :  { %1541 = vsyncpa [#allocation8 + $0x1], 1 }

</bundles_post_ra>
